<compile_context>
chip_gen: v7x
topology: tpu7x:2x2x1
jax: 0.10.0
libtpu: 0.0.40
codegen_flags: <defaults>
</compile_context>

<pallas_src>
import jax
import jax.numpy as jnp
from jax.experimental import pallas as pl
from jax.experimental.pallas import tpu as pltpu


LANE = 128
_SUBLANE_BY_ITEMSIZE = {4: 8, 2: 16, 1: 32}


def _round_up(a: int, b: int) -> int:
    return (a + b - 1) // b * b


def _pick_tile(full: int, max_tile: int, unit: int) -> int:
    """Largest multiple of `unit` that divides `full` and is <= max_tile."""
    if full <= max_tile:
        return full
    m = full // unit
    for d in range(max(max_tile // unit, 1), 0, -1):
        if m % d == 0:
            return d * unit
    return unit


def _vmem_limit_bytes() -> int:
    """Generation-aware scoped-VMEM request (leave headroom for compiler scratch)."""
    cap = 128 * 1024 * 1024
    try:
        cap = int(getattr(pltpu.get_tpu_info(), "vmem_capacity_bytes", cap))
    except Exception:
        pass
    return min(cap * 3 // 4, 100 * 1024 * 1024)


def _fconv_kernel_f32(x_ref, w_ref, b_ref, o_ref):
    """f32 output: accumulate directly into the resident (i, j) output tile."""
    k = pl.program_id(2)

    @pl.when(k == 0)
    def _init():
        o_ref[...] = jnp.zeros_like(o_ref)

    o_ref[...] += jnp.dot(
        x_ref[...], w_ref[...], preferred_element_type=jnp.float32
    )

    @pl.when(k == pl.num_programs(2) - 1)
    def _finalize():
        o_ref[...] = jnp.maximum(o_ref[...] + b_ref[...], 0.0)


def _fconv_kernel_acc(x_ref, w_ref, b_ref, o_ref, acc_ref):
    """Non-f32 output: keep a separate f32 VMEM accumulator across k."""
    k = pl.program_id(2)

    @pl.when(k == 0)
    def _init():
        acc_ref[...] = jnp.zeros_like(acc_ref)

    acc_ref[...] += jnp.dot(
        x_ref[...], w_ref[...], preferred_element_type=jnp.float32
    )

    @pl.when(k == pl.num_programs(2) - 1)
    def _finalize():
        o_ref[...] = jnp.maximum(acc_ref[...] + b_ref[...], 0.0).astype(o_ref.dtype)


def fconv_prepare_params(weight, bias, *, compute_dtype=jnp.bfloat16):
    """One-time parameter prep (do at init / checkpoint-load time).

    weight: (C_out, C_in)  -- Conv2d kernel with the trailing 1x1 squeezed.
    bias:   (C_out,)
    Returns pre-transposed, pre-padded, pre-cast parameters so the per-call
    forward path does no weight copies at all.
    """
    c_out, c_in = weight.shape
    ci_p = _round_up(c_in, LANE)
    co_p = _round_up(c_out, LANE)

    w_t = weight.T.astype(compute_dtype)  # (C_in, C_out)
    if (ci_p, co_p) != (c_in, c_out):
        w_t = jnp.pad(w_t, ((0, ci_p - c_in), (0, co_p - c_out)))

    b = bias.astype(jnp.float32).reshape(1, c_out)
    if co_p != c_out:
        b = jnp.pad(b, ((0, 0), (0, co_p - c_out)))

    return {"w_t": w_t, "bias": b, "c_in": c_in, "c_out": c_out}


def fconv_forward(
    x,
    params,
    *,
    tile_n=1024,
    tile_co=1024,
    tile_ci=512,
    weight_resident_max_bytes=8 * 1024 * 1024,
):
    """x: (N, C_in). Returns relu(x @ W^T + b) of shape (N, C_out) in x.dtype."""
    w_t, b2 = params["w_t"], params["bias"]
    c_in, c_out = params["c_in"], params["c_out"]
    n, c_in_x = x.shape
    assert c_in_x == c_in, "weight / input channel mismatch"

    out_dtype = x.dtype
    compute_dtype = w_t.dtype
    ci_p, co_p = w_t.shape

    itemsize = jnp.dtype(compute_dtype).itemsize
    sublane = _SUBLANE_BY_ITEMSIZE.get(itemsize, 8)

    # ---- C_out / C_in tile selection (weight padding fixed at prep time) ----
    if co_p <= tile_co and ci_p * co_p * itemsize <= weight_resident_max_bytes:
        # Whole weight as one VMEM-resident block: a single weight DMA for the
        # entire call and the reduction axis collapses to one step.
        tco, tci = co_p, ci_p
    else:
        tco = _pick_tile(co_p, tile_co, LANE)
        tci = _pick_tile(ci_p, tile_ci, LANE)

    # ---- N tile: dtype-aware sublane minimum (8 f32 / 16 bf16 / 32 int8) ----
    tn = _round_up(min(tile_n, _round_up(n, sublane)), sublane)

    # ---- megacore (v7x): expose >= 2 blocks on a parallel axis if possible ----
    if _round_up(n, tn) // tn == 1 and co_p // tco == 1:
        if tco % (2 * LANE) == 0:
            tco //= 2
        elif tn >= 2 * sublane and tn % (2 * sublane) == 0:
            tn //= 2

    n_p = _round_up(n, tn)

    # Per-call activation cast + pad (zeros contribute 0 to the dot; padded
    # output rows are sliced off below).
    x = x.astype(compute_dtype)
    if (n_p, ci_p) != (n, c_in):
        x = jnp.pad(x, ((0, n_p - n), (0, ci_p - c_in)))

    grid = (n_p // tn, co_p // tco, ci_p // tci)

    # Cost estimate reflecting actual streamed HBM traffic.
    out_item = jnp.dtype(out_dtype).itemsize
    cost = pl.CostEstimate(
        flops=2 * n_p * ci_p * co_p,
        transcendentals=0,
        bytes_accessed=(
            n_p * ci_p * itemsize * grid[1]      # x read once per C_out tile
            + ci_p * co_p * itemsize * grid[0]   # W read once per N tile
            + co_p * 4                           # bias
            + n_p * co_p * out_item              # output write
        ),
    )

    in_specs = [
        # x tile: depends on (N tile, K tile) only.
        pl.BlockSpec((tn, tci), lambda i, j, k: (i, k)),
        # weight tile: independent of the N axis (stays resident while the
        # (k, j) block indices don't change).
        pl.BlockSpec((tci, tco), lambda i, j, k: (k, j)),
        # bias tile: depends on the C_out tile only.
        pl.BlockSpec((1, tco), lambda i, j, k: (0, j)),
    ]
    out_spec = pl.BlockSpec((tn, tco), lambda i, j, k: (i, j))

    if out_dtype == jnp.float32:
        kernel = _fconv_kernel_f32
        scratch_shapes = []
    else:
        kernel = _fconv_kernel_acc
        scratch_shapes = [pltpu.VMEM((tn, tco), jnp.float32)]

    out = pl.pallas_call(
        kernel,
        out_shape=jax.ShapeDtypeStruct((n_p, co_p), out_dtype),
        grid_spec=pltpu.PrefetchScalarGridSpec(
            num_scalar_prefetch=0,
            grid=grid,
            in_specs=in_specs,
            out_specs=out_spec,
            scratch_shapes=scratch_shapes,
        ),
        compiler_params=pltpu.CompilerParams(
            dimension_semantics=("parallel", "parallel", "arbitrary"),
            vmem_limit_bytes=_vmem_limit_bytes(),
        ),
        cost_estimate=cost,
    )(x, w_t, b2)

    if (n_p, co_p) != (n, c_out):
        out = out[:n, :c_out]
    return out


if __name__ == "__main__":
    # Small, module-consistent shapes: batch=8, in_channels=32, out_channels=64.
    # TODO(synk): at shapes this tiny the op is sub-microsecond; in a real model
    # this layer should be fused into a neighboring kernel or left to XLA.
    N, C_IN, C_OUT = 8, 32, 64

    key = jax.random.PRNGKey(0)
    kx, kw, kb = jax.random.split(key, 3)

    x = jax.random.normal(kx, (N, C_IN), dtype=jnp.float32)
    # Conv2d weight shape (C_out, C_in, 1, 1) -> squeeze to (C_out, C_in).
    weight = jax.random.normal(kw, (C_OUT, C_IN), dtype=jnp.float32) * 0.1
    bias = jax.random.normal(kb, (C_OUT,), dtype=jnp.float32) * 0.1

    # Pure-JAX reference of the PyTorch forward.
    ref = jnp.maximum(x @ weight.T + bias[None, :], 0.0)

    # f32 compute path: exact parity with PyTorch Conv2d defaults.
    params_f32 = fconv_prepare_params(weight, bias, compute_dtype=jnp.float32)
    out_f32 = jax.block_until_ready(fconv_forward(x, params_f32))
    assert out_f32.shape == (N, C_OUT)
    assert jnp.allclose(out_f32, ref, atol=1e-5, rtol=1e-5), "f32 path mismatch"

    # bf16 compute path (deployment default): MXU bf16 rate, half x/W DMA bytes,
    # f32 accumulation inside the kernel.
    params_bf16 = fconv_prepare_params(weight, bias)  # bf16 by default
    out_bf16 = jax.block_until_ready(fconv_forward(x, params_bf16))
    assert out_bf16.shape == (N, C_OUT)
    assert jnp.allclose(out_bf16, ref, atol=3e-2, rtol=3e-2), "bf16 path mismatch"

    print("KERNEL_OK")
</pallas_src>

<mosaic_0001>
module attributes {stable_mosaic.version = 11 : i64} {
  func.func @_fconv_kernel_f32(%arg0: i32, %arg1: i32, %arg2: i32, %arg3: memref<8x128xf32, #tpu.memory_space<vmem>>, %arg4: memref<128x128xf32, #tpu.memory_space<vmem>>, %arg5: memref<1x128xf32, #tpu.memory_space<vmem>>, %arg6: memref<8x128xf32, #tpu.memory_space<vmem>>) attributes {dimension_semantics = [#tpu.dimension_semantics<parallel>, #tpu.dimension_semantics<parallel>, #tpu.dimension_semantics<arbitrary>], iteration_bounds = array<i64: 1, 1, 1>, scalar_prefetch = 0 : i64, scratch_operands = 0 : i64, tpu.core_type = #tpu.core_type<tc>, window_params = [{transform_indices = @transform_0, window_bounds = array<i64: 8, 128>}, {transform_indices = @transform_1, window_bounds = array<i64: 128, 128>}, {transform_indices = @transform_2, window_bounds = array<i64: 1, 128>}, {transform_indices = @transform_3, window_bounds = array<i64: 8, 128>}]} {
    %c0_i32 = arith.constant 0 : i32
    %0 = arith.cmpi eq, %arg2, %c0_i32 : i32
    %1 = arith.extui %0 : i1 to i32
    %c0_i32_0 = arith.constant 0 : i32
    %2 = arith.cmpi ne, %1, %c0_i32_0 : i32
    scf.if %2 {
      %cst_10 = arith.constant 0.000000e+00 : f32
      %12 = vector.broadcast %cst_10 : f32 to vector<8x128xf32>
      %c0_11 = arith.constant 0 : index
      %c0_12 = arith.constant 0 : index
      %13 = vector.load %arg6[%c0_11, %c0_12] : memref<8x128xf32, #tpu.memory_space<vmem>>, vector<8x128xf32>
      tpu.vector_store %arg6[%c0_11, %c0_12], %12 {strides = array<i32>} : memref<8x128xf32, #tpu.memory_space<vmem>>, vector<8x128xf32>,
    } else {
    }
    %c0 = arith.constant 0 : index
    %c0_1 = arith.constant 0 : index
    %3 = vector.load %arg6[%c0, %c0_1] : memref<8x128xf32, #tpu.memory_space<vmem>>, vector<8x128xf32>
    %c0_2 = arith.constant 0 : index
    %c0_3 = arith.constant 0 : index
    %4 = vector.load %arg3[%c0_2, %c0_3] : memref<8x128xf32, #tpu.memory_space<vmem>>, vector<8x128xf32>
    %c0_4 = arith.constant 0 : index
    %c0_5 = arith.constant 0 : index
    %5 = vector.load %arg4[%c0_4, %c0_5] : memref<128x128xf32, #tpu.memory_space<vmem>>, vector<128x128xf32>
    %cst = arith.constant dense<0.000000e+00> : vector<8x128xf32>
    %6 = tpu.matmul %4, %5, %cst {dimension_numbers = #tpu.dot_dimension_numbers<[1], [0], [0], [1], [0, 0, 1, 1], [], []>} : vector<8x128xf32>, vector<128x128xf32>, vector<8x128xf32> -> vector<8x128xf32>
    %7 = arith.addf %3, %6 : vector<8x128xf32>
    %c0_6 = arith.constant 0 : index
    %c0_7 = arith.constant 0 : index
    %8 = vector.load %arg6[%c0_6, %c0_7] : memref<8x128xf32, #tpu.memory_space<vmem>>, vector<8x128xf32>
    tpu.vector_store %arg6[%c0_6, %c0_7], %7 {strides = array<i32>} : memref<8x128xf32, #tpu.memory_space<vmem>>, vector<8x128xf32>,
    %c0_i32_8 = arith.constant 0 : i32
    %9 = arith.cmpi eq, %arg2, %c0_i32_8 : i32
    %10 = arith.extui %9 : i1 to i32
    %c0_i32_9 = arith.constant 0 : i32
    %11 = arith.cmpi ne, %10, %c0_i32_9 : i32
    scf.if %11 {
      %c0_10 = arith.constant 0 : index
      %c0_11 = arith.constant 0 : index
      %12 = vector.load %arg6[%c0_10, %c0_11] : memref<8x128xf32, #tpu.memory_space<vmem>>, vector<8x128xf32>
      %c0_12 = arith.constant 0 : index
      %c0_13 = arith.constant 0 : index
      %13 = vector.load %arg5[%c0_12, %c0_13] : memref<1x128xf32, #tpu.memory_space<vmem>>, vector<1x128xf32>
      %14 = vector.broadcast %13 : vector<1x128xf32> to vector<8x128xf32>
      %15 = arith.addf %12, %14 : vector<8x128xf32>
      %cst_14 = arith.constant 0.000000e+00 : f32
      %16 = vector.broadcast %cst_14 : f32 to vector<8x128xf32>
      %17 = arith.maximumf %15, %16 : vector<8x128xf32>
      %c0_15 = arith.constant 0 : index
      %c0_16 = arith.constant 0 : index
      %18 = vector.load %arg6[%c0_15, %c0_16] : memref<8x128xf32, #tpu.memory_space<vmem>>, vector<8x128xf32>
      tpu.vector_store %arg6[%c0_15, %c0_16], %17 {strides = array<i32>} : memref<8x128xf32, #tpu.memory_space<vmem>>, vector<8x128xf32>,
    } else {
    }
    return
  }
  func.func @transform_0(%arg0: i32, %arg1: i32, %arg2: i32) -> (i32, i32) {
    %c0_i32 = arith.constant 0 : i32
    return %arg0, %arg2 : i32, i32
  }
  func.func @transform_1(%arg0: i32, %arg1: i32, %arg2: i32) -> (i32, i32) {
    %c0_i32 = arith.constant 0 : i32
    return %arg2, %arg1 : i32, i32
  }
  func.func @transform_2(%arg0: i32, %arg1: i32, %arg2: i32) -> (i32, i32) {
    %c0_i32 = arith.constant 0 : i32
    %c0_i32_0 = arith.constant 0 : i32
    return %c0_i32, %arg1 : i32, i32
  }
  func.func @transform_3(%arg0: i32, %arg1: i32, %arg2: i32) -> (i32, i32) {
    %c0_i32 = arith.constant 0 : i32
    return %arg0, %arg1 : i32, i32
  }
}

</mosaic_0001>

<bundles_post_ra>
// kernel: tpu_custom_call.1
= control target key start
LH: loop header
LB: loop body
LE: loop exit
PB: predicated region body
PF: predicated region fallthrough
CT: control target
= control target key end

     0   :  { %8 = vsyncpa [#allocation3], 0  ;;  %s434_s0 = inlined_call_operand.hbm [shape: f32[8,128], index: 0, kind: input, shape index: {}]   ;;  %s435_s1 = inlined_call_operand.hbm [shape: f32[128,128], index: 1, kind: input, shape index: {}]   ;;  %s436_s2 = inlined_call_operand.hbm [shape: f32[1,128], index: 2, kind: input, shape index: {}]   ;;  %s437_s3 = inlined_call_operand.hbm [shape: f32[8,128], index: 3, kind: output, shape index: {}]  }
   0x1   :  { %9 = vsyncpa [#allocation6], 0 }
   0x2   :  { %10 = vsyncpa [#allocation4], 0  ;;  %s357_s12 = smov [#allocation5]   ;;  %s263_s16 = scalar_lea.hbm %s435_s1, 2048 }
   0x3   :  { %s26_s13 = sshll.u32 %s357_s12, 4  ;;  %p264_p0 = scmp.ne.s32.totalorder %s435_s1, %s263_s16  ;;  %s27_s13 = int_to_ptr.vmem [resolvable:$true] %s26_s13 }
   0x4   :  { %p267_p1 = scmp.lt.u32.totalorder %s263_s16, %s435_s1 }
   0x6   :  { %p269_p2 = pnand %p267_p1, %p264_p0 }
   0x8   :  { %272 = shalt.err (!%p269_p2)
}
   0x9   :  { %s273_s21 = scalar_lea.vmem %s27_s13, 2048  ;;  %p278_p4 = scmp.lt.s32.totalorder %s27_s13, %s27_s13 }
   0xa   :  { %p274_p3 = scmp.ne.s32.totalorder %s27_s13, %s273_s21  ;;  %p279_p5 = scmp.lt.s32.totalorder %s273_s21, %s273_s21 }
   0xc   :  { %p280_p6 = por %p279_p5, %p278_p4 }
   0xe   :  { %p281_p7 = pnand %p280_p6, %p274_p3 }
  0x10   :  { %284 = shalt.err (!%p281_p7)
}
  0x11   :  { %s358_s22 = smov 128   ;;  %s359_s23 = smov 8  }
  0x12   :  { %32 = dma.hbm_to_vmem [thread:$0]  %s435_s1, 2048, %s27_s13, [#allocation6], %s358_s22, %s358_s22, %s359_s23  }
  0x13   :  { %s360_s26 = smov [#allocation2]   ;;  %s361_s28 = smov [#allocation7]  }
  0x14   :  { %s17_s27 = sshll.u32 %s360_s26, 4  ;;  %s39_s29 = sshll.u32 %s361_s28, 4  ;;  %s18_s27 = int_to_ptr.vmem [resolvable:$true] %s17_s27  ;;  %s40_s29 = int_to_ptr.vmem [resolvable:$true] %s39_s29 }
  0x15   :  { %s285_s5 = scalar_lea.hbm %s434_s0, 128 }
  0x16   :  { %p286_p8 = scmp.ne.s32.totalorder %s434_s0, %s285_s5  ;;  %p289_p9 = scmp.lt.u32.totalorder %s285_s5, %s434_s0 }
  0x18   :  { %p291_p10 = pnand %p289_p9, %p286_p8 }
  0x1a   :  { %294 = shalt.err (!%p291_p10)
}
  0x1b   :  { %s295_s1 = scalar_lea.vmem %s18_s27, 128  ;;  %p300_p12 = scmp.lt.s32.totalorder %s18_s27, %s18_s27 }
  0x1c   :  { %p296_p11 = scmp.ne.s32.totalorder %s18_s27, %s295_s1  ;;  %p301_p13 = scmp.lt.s32.totalorder %s295_s1, %s295_s1 }
  0x1e   :  { %p302_p0 = por %p301_p13, %p300_p12 }
  0x20   :  { %p303_p1 = pnand %p302_p0, %p296_p11 }
  0x22   :  { %306 = shalt.err (!%p303_p1)
}
  0x23   :  { %20 = dma.hbm_to_vmem [thread:$0]  %s434_s0, 128, %s18_s27, [#allocation3]  }
  0x24   :  { %s307_s14 = scalar_lea.hbm %s436_s2, 16 }
  0x25   :  { %p308_p2 = scmp.ne.s32.totalorder %s436_s2, %s307_s14  ;;  %p311_p3 = scmp.lt.u32.totalorder %s307_s14, %s436_s2 }
  0x27   :  { %p313_p4 = pnand %p311_p3, %p308_p2 }
  0x29   :  { %316 = shalt.err (!%p313_p4)
}
  0x2a   :  { %s317_s19 = scalar_lea.vmem %s40_s29, 16  ;;  %s321_s20 = scalar_lea.vmem %s40_s29, 32 }
  0x2b   :  { %p318_p5 = scmp.ne.s32.totalorder %s40_s29, %s317_s19  ;;  %p322_p6 = scmp.lt.s32.totalorder %s40_s29, %s40_s29 }
  0x2c   :  { %p323_p7 = scmp.lt.s32.totalorder %s321_s20, %s317_s19 }
  0x2e   :  { %p324_p8 = por %p323_p7, %p322_p6 }
  0x30   :  { %p325_p9 = pnand %p324_p8, %p318_p5 }
  0x32   :  { %328 = shalt.err (!%p325_p9)
}
  0x33   :  { %42 = dma.hbm_to_vmem [thread:$0]  %s436_s2, 16, %s40_s29, [#allocation6]  }
  0x34   :  { %351 = dma.done.wait [#allocation3], 128  }
  0x35   :  { %352 = vsyncadd [#allocation3], 4294967168 }
  0x36   :  { %353 = dma.done.wait [#allocation6], 2064  }
  0x37   :  { %354 = vsyncadd [#allocation6], 4294965232  ;;  %v362_v0 = vmov 0.0|0.0   ;;  %vm363_vm0 = vmmov 0   ;;  %v364_v1 = vmov 0.0   ;;  %v59_v2 = vld [vmem:[#allocation5] sm:$0xff] }
  0x38   :  { %230 = vmatprep.subr.bf16.mxu0 %v362_v0  ;;  %227 = vmatprep.mubr.msk.f32.mxu0 %vm363_vm0, %v364_v1  ;;  %v60_v3 = vld [vmem:[#allocation5 + $0x8] sm:$0xff]  ;;  %v61_v4 = vld [vmem:[#allocation5 + $0x10] sm:$0xff]  ;;  %v62_v6 = vld [vmem:[#allocation5 + $0x18] sm:$0xff]  ;;  %s365_s2 = smov [#allocation8]  }
  0x39   :  { %v231_v5 = vpack.c.bf16 %v60_v3, %v59_v2  ;;  %v234_v7 = vpack.c.bf16 %v62_v6, %v61_v4  ;;  %v63_v8 = vld [vmem:[#allocation5 + $0x20] sm:$0xff]  ;;  %v64_v9 = vld [vmem:[#allocation5 + $0x28] sm:$0xff]  ;;  %v65_v11 = vld [vmem:[#allocation5 + $0x30] sm:$0xff]  ;;  %s167_s22 = sshll.u32 %s365_s2, 4  ;;  %s168_s22 = int_to_ptr.vmem [resolvable:$true] %s167_s22 }
  0x3a   :  { %v237_v10 = vpack.c.bf16 %v64_v9, %v63_v8  ;;  %v66_v12 = vld [vmem:[#allocation5 + $0x38] sm:$0xff]  ;;  %v67_v14 = vld [vmem:[#allocation5 + $0x40] sm:$0xff]  ;;  %v68_v15 = vld [vmem:[#allocation5 + $0x48] sm:$0xff]  ;;  %s329_s23 = scalar_lea.vmem %s168_s22, 128  ;;  %p334_p11 = scmp.lt.s32.totalorder %s168_s22, %s168_s22 }
  0x3b   :  { %232 = vmatpush3.bf16.msra.mxu0 %v231_v5  ;;  %v240_v13 = vpack.c.bf16 %v66_v12, %v65_v11  ;;  %v243_v16 = vpack.c.bf16 %v68_v15, %v67_v14  ;;  %v69_v17 = vld [vmem:[#allocation5 + $0x50] sm:$0xff]  ;;  %v70_v18 = vld [vmem:[#allocation5 + $0x58] sm:$0xff]  ;;  %v71_v20 = vld [vmem:[#allocation5 + $0x60] sm:$0xff]  ;;  %p330_p10 = scmp.ne.s32.totalorder %s168_s22, %s329_s23  ;;  %p335_p12 = scmp.lt.s32.totalorder %s329_s23, %s329_s23 }
  0x3c   :  { %233 = vmatprep.subr.bf16.mxu0 %v362_v0  ;;  %v246_v19 = vpack.c.bf16 %v70_v18, %v69_v17  ;;  %v72_v21 = vld [vmem:[#allocation5 + $0x68] sm:$0xff]  ;;  %v73_v23 = vld [vmem:[#allocation5 + $0x70] sm:$0xff]  ;;  %v74_v24 = vld [vmem:[#allocation5 + $0x78] sm:$0xff] }
  0x3d   :  { %v249_v22 = vpack.c.bf16 %v72_v21, %v71_v20  ;;  %v252_v25 = vpack.c.bf16 %v74_v24, %v73_v23  ;;  %v58_v26 = vld [vmem:[#allocation2] sm:$0xff]  ;;  %v177_v28 = vld [vmem:[#allocation7] ss:$0 sm:$0xff]  ;;  %p336_p13 = por %p335_p12, %p334_p11 }
  0x3f   :  { %235 = vmatpush3.bf16.msra.mxu0 %v234_v7  ;;  %p337_p0 = pnand %p336_p13, %p330_p10 }
  0x40   :  { %236 = vmatprep.subr.bf16.mxu0 %v362_v0 }
  0x43   :  { %238 = vmatpush3.bf16.msra.mxu0 %v237_v10 }
  0x44   :  { %239 = vmatprep.subr.bf16.mxu0 %v362_v0 }
  0x47   :  { %241 = vmatpush3.bf16.msra.mxu0 %v240_v13 }
  0x48   :  { %242 = vmatprep.subr.bf16.mxu0 %v362_v0 }
  0x4b   :  { %244 = vmatpush3.bf16.msra.mxu0 %v243_v16 }
  0x4c   :  { %245 = vmatprep.subr.bf16.mxu0 %v362_v0 }
  0x4f   :  { %247 = vmatpush3.bf16.msra.mxu0 %v246_v19 }
  0x50   :  { %248 = vmatprep.subr.bf16.mxu0 %v362_v0 }
  0x53   :  { %250 = vmatpush3.bf16.msra.mxu0 %v249_v22 }
  0x54   :  { %251 = vmatprep.subr.bf16.mxu0 %v362_v0 }
  0x57   :  { %253 = vmatpush3.bf16.msra.mxu0 %v252_v25 }
  0x5a   :  { %228 = vmatmul.mubr.f32.vlgmr.msra.gmra.mrb[0].mxu0 %v58_v26 }
 0x12d   :  { %v141_v27 = vpop.f32.mrb[0].mxu0 }
 0x12e   :  { %v229_v29 = vpop.f32.mrb[1].mxu0  ;;  %v158_v30 = vadd.f32 %v177_v28, %v141_v27 }
 0x130   :  { %v159_v31 = vmax.f32 %v158_v30, 0.0 }
 0x132   :  { %160 = vst [vmem:[#allocation8] sm:$0xff] %v159_v31 }
 0x133   :  { %340 = shalt.err (!%p337_p0)
}
 0x134   :  { %s341_s26 = scalar_lea.hbm %s437_s3, 128 }
 0x135   :  { %p342_p1 = scmp.ne.s32.totalorder %s437_s3, %s341_s26  ;;  %p345_p2 = scmp.lt.u32.totalorder %s341_s26, %s437_s3 }
 0x137   :  { %p347_p3 = pnand %p345_p2, %p342_p1 }
 0x139   :  { %350 = shalt.err (!%p347_p3)
}
 0x13a   :  { %170 = dma.vmem_to_hbm [thread:$0]  %s168_s22, 128, %s437_s3, [#allocation4]  }
 0x13b   :  { %355 = dma.done.wait [#allocation4], 128  }
 0x13c   :  { %356 = vsyncadd [#allocation4], 4294967168 }
 0x13d   :  { %174 = vsyncpa [#allocation3], 1 }
 0x13e   :  { %175 = vsyncpa [#allocation6], 1 }
 0x13f   :  { %176 = vsyncpa [#allocation4], 1 }

</bundles_post_ra>
